<compile_context>
chip_gen: v6e
topology: v6e:2x2x1
jax: 0.10.0
libtpu: 0.0.40
codegen_flags: <defaults>
</compile_context>

<pallas_src>
import jax
import jax.numpy as jnp
from jax.experimental import pallas as pl
from jax.experimental.pallas import tpu as pltpu


def _round_up(n: int, m: int) -> int:
    return ((n + m - 1) // m) * m


def mlp_kernel(x_ref, w1_ref, b1_ref, w2_ref, b2_ref, o_ref, acc_ref):
    # x_ref : (tile_m, C)        w1_ref: (C, tile_h)   b1_ref: (1, tile_h)
    # w2_ref: (tile_h, C)        b2_ref: (1, C)
    # o_ref : (tile_m, C)        acc_ref: (tile_m, C) f32 scratch
    k = pl.program_id(1)

    @pl.when(k == 0)
    def _():
        acc_ref[...] = jnp.zeros_like(acc_ref)

    # c_fc slab: native-dtype operands straight into the MXU, f32 accumulate.
    h = jnp.dot(x_ref[...], w1_ref[...], preferred_element_type=jnp.float32)
    h = h + b1_ref[...].astype(jnp.float32)

    # GELU(approximate='tanh') on the (tile_m, tile_h) chunk:
    # 0.5 * h * (1 + tanh(sqrt(2/pi) * (h + 0.044715 * h^3)))
    c = 0.7978845608028654  # sqrt(2/pi)
    h = 0.5 * h * (1.0 + jnp.tanh(c * (h + 0.044715 * h * h * h)))

    # c_proj partial: (tile_m, tile_h) @ (tile_h, C), accumulated in f32.
    acc_ref[...] += jnp.dot(h.astype(w2_ref.dtype), w2_ref[...],
                            preferred_element_type=jnp.float32)

    @pl.when(k == pl.num_programs(1) - 1)
    def _():
        o_ref[...] = (acc_ref[...]
                      + b2_ref[...].astype(jnp.float32)).astype(o_ref.dtype)


def mlp_pallas(x, w1, b1, w2, b2, *, tile_m=256, tile_h=512):
    """GPT-2 MLP forward: GELU_tanh(x @ W1 + b1) @ W2 + b2.

    x: (B, T, C); w1: (C, 4C); b1: (4C,); w2: (4C, C); b2: (C,).
    """
    B, T, C = x.shape
    H = w1.shape[1]
    M = B * T

    # Row tile: multiple of 8 (sublane), shrunk for small problems; pad M.
    tile_m = min(tile_m, _round_up(M, 8))
    Mp = _round_up(M, tile_m)

    # Hidden tile: multiple of 128 (lane) so weight slabs stay small in VMEM.
    tile_h = min(tile_h, H)
    if H % tile_h != 0:
        tile_h = H  # TODO(synk): pad H for ragged hidden sizes if ever needed.

    x2d = x.reshape(M, C)
    if Mp != M:
        x2d = jnp.pad(x2d, ((0, Mp - M), (0, 0)))
    b1_2d = b1.reshape(1, H)
    b2_2d = b2.reshape(1, C)

    grid = (Mp // tile_m, H // tile_h)

    # VMEM budget: double-buffered x/out tiles + weight/bias slabs,
    # f32 accumulator scratch and the per-step (tile_m, tile_h) intermediate.
    itemsize = jnp.dtype(x.dtype).itemsize
    vmem_bytes = (
        2 * tile_m * C * itemsize          # x tile (double-buffered)
        + 2 * tile_m * C * itemsize        # out tile
        + 2 * C * tile_h * itemsize        # W1 slab
        + 2 * tile_h * C * itemsize        # W2 slab
        + 2 * (tile_h + C) * itemsize      # biases
        + tile_m * C * 4                   # f32 accumulator scratch
        + 2 * tile_m * tile_h * 4          # f32 GELU intermediate + slack
    )
    vmem_limit = min(int(1.5 * vmem_bytes) + (8 << 20), 96 << 20)

    out2d = pl.pallas_call(
        mlp_kernel,
        out_shape=jax.ShapeDtypeStruct((Mp, C), x.dtype),
        grid_spec=pltpu.PrefetchScalarGridSpec(
            num_scalar_prefetch=0,
            grid=grid,
            in_specs=[
                pl.BlockSpec((tile_m, C), lambda i, k: (i, 0)),   # x row tile
                pl.BlockSpec((C, tile_h), lambda i, k: (0, k)),   # W1 slab
                pl.BlockSpec((1, tile_h), lambda i, k: (0, k)),   # b1 slab
                pl.BlockSpec((tile_h, C), lambda i, k: (k, 0)),   # W2 slab
                pl.BlockSpec((1, C), lambda i, k: (0, 0)),        # b2
            ],
            out_specs=pl.BlockSpec((tile_m, C), lambda i, k: (i, 0)),
            scratch_shapes=[pltpu.VMEM((tile_m, C), jnp.float32)],
        ),
        compiler_params=pltpu.CompilerParams(
            dimension_semantics=("parallel", "arbitrary"),
            vmem_limit_bytes=vmem_limit,
        ),
    )(x2d, w1, b1_2d, w2, b2_2d)

    if Mp != M:
        out2d = out2d[:M]
    return out2d.reshape(B, T, C)


def mlp_ref(x, w1, b1, w2, b2):
    """Pure-JAX f32 reference."""
    xf = x.astype(jnp.float32)
    h = jnp.dot(xf, w1.astype(jnp.float32)) + b1.astype(jnp.float32)
    h = 0.5 * h * (1.0 + jnp.tanh(0.7978845608028654 * (h + 0.044715 * h ** 3)))
    return jnp.dot(h, w2.astype(jnp.float32)) + b2.astype(jnp.float32)


if __name__ == "__main__":
    key = jax.random.PRNGKey(0)

    # --- Check 1: small f32 demo (n_embd=32, seq=8, batch=2; hidden=128) ---
    B, T, C = 2, 8, 32
    H = 4 * C
    kx, kw1, kb1, kw2, kb2 = jax.random.split(key, 5)
    x = jax.random.normal(kx, (B, T, C), dtype=jnp.float32)
    w1 = jax.random.normal(kw1, (C, H), dtype=jnp.float32) * 0.02
    b1 = jax.random.normal(kb1, (H,), dtype=jnp.float32) * 0.02
    w2 = jax.random.normal(kw2, (H, C), dtype=jnp.float32) * 0.02
    b2 = jax.random.normal(kb2, (C,), dtype=jnp.float32) * 0.02

    out = jax.block_until_ready(mlp_pallas(x, w1, b1, w2, b2))
    ref = mlp_ref(x, w1, b1, w2, b2)
    assert out.shape == (B, T, C)
    assert jnp.allclose(out, ref, atol=1e-5, rtol=1e-5)

    # --- Check 2: lane-dense bf16 run exercising M- and H-tiling ---
    B2, T2, C2 = 2, 256, 256
    H2 = 4 * C2
    k2 = jax.random.split(jax.random.PRNGKey(1), 5)
    xb = jax.random.normal(k2[0], (B2, T2, C2), dtype=jnp.float32)
    w1b = jax.random.normal(k2[1], (C2, H2), dtype=jnp.float32) * 0.02
    b1b = jax.random.normal(k2[2], (H2,), dtype=jnp.float32) * 0.02
    w2b = jax.random.normal(k2[3], (H2, C2), dtype=jnp.float32) * 0.02
    b2b = jax.random.normal(k2[4], (C2,), dtype=jnp.float32) * 0.02

    xb16, w1b16, b1b16 = xb.astype(jnp.bfloat16), w1b.astype(jnp.bfloat16), b1b.astype(jnp.bfloat16)
    w2b16, b2b16 = w2b.astype(jnp.bfloat16), b2b.astype(jnp.bfloat16)

    out_bf16 = jax.block_until_ready(
        mlp_pallas(xb16, w1b16, b1b16, w2b16, b2b16, tile_m=256, tile_h=512))
    ref_bf16 = mlp_ref(xb16, w1b16, b1b16, w2b16, b2b16)
    assert out_bf16.shape == (B2, T2, C2)
    # bf16 operands / bf16 GELU output -> looser tolerance vs f32 reference.
    assert jnp.allclose(out_bf16.astype(jnp.float32), ref_bf16,
                        atol=3e-2, rtol=3e-2)

    print("KERNEL_OK")
</pallas_src>

<mosaic_0001>
module attributes {stable_mosaic.version = 11 : i64} {
  func.func @mlp_kernel(%arg0: i32, %arg1: i32, %arg2: memref<16x32xf32, #tpu.memory_space<vmem>>, %arg3: memref<32x128xf32, #tpu.memory_space<vmem>>, %arg4: memref<1x128xf32, #tpu.memory_space<vmem>>, %arg5: memref<128x32xf32, #tpu.memory_space<vmem>>, %arg6: memref<1x32xf32, #tpu.memory_space<vmem>>, %arg7: memref<16x32xf32, #tpu.memory_space<vmem>>, %arg8: memref<16x32xf32, #tpu.memory_space<vmem>>) attributes {dimension_semantics = [#tpu.dimension_semantics<parallel>, #tpu.dimension_semantics<arbitrary>], iteration_bounds = array<i64: 1, 1>, scalar_prefetch = 0 : i64, scratch_operands = 1 : i64, tpu.core_type = #tpu.core_type<tc>, window_params = [{transform_indices = @transform_0, window_bounds = array<i64: 16, 32>}, {transform_indices = @transform_1, window_bounds = array<i64: 32, 128>}, {transform_indices = @transform_2, window_bounds = array<i64: 1, 128>}, {transform_indices = @transform_3, window_bounds = array<i64: 128, 32>}, {pipeline_mode = #tpu.pipeline_mode<synchronous>, transform_indices = @transform_4, window_bounds = array<i64: 1, 32>}, {transform_indices = @transform_5, window_bounds = array<i64: 16, 32>}]} {
    %c0_i32 = arith.constant 0 : i32
    %0 = arith.cmpi eq, %arg1, %c0_i32 : i32
    %1 = arith.extui %0 : i1 to i32
    %c0_i32_0 = arith.constant 0 : i32
    %2 = arith.cmpi ne, %1, %c0_i32_0 : i32
    scf.if %2 {
      %cst_19 = arith.constant 0.000000e+00 : f32
      %30 = vector.broadcast %cst_19 : f32 to vector<16x32xf32>
      %c0_20 = arith.constant 0 : index
      %c0_21 = arith.constant 0 : index
      %31 = vector.load %arg8[%c0_20, %c0_21] : memref<16x32xf32, #tpu.memory_space<vmem>>, vector<16x32xf32>
      tpu.vector_store %arg8[%c0_20, %c0_21], %30 {strides = array<i32>} : memref<16x32xf32, #tpu.memory_space<vmem>>, vector<16x32xf32>,
    } else {
    }
    %c0 = arith.constant 0 : index
    %c0_1 = arith.constant 0 : index
    %3 = vector.load %arg2[%c0, %c0_1] : memref<16x32xf32, #tpu.memory_space<vmem>>, vector<16x32xf32>
    %c0_2 = arith.constant 0 : index
    %c0_3 = arith.constant 0 : index
    %4 = vector.load %arg3[%c0_2, %c0_3] : memref<32x128xf32, #tpu.memory_space<vmem>>, vector<32x128xf32>
    %cst = arith.constant dense<0.000000e+00> : vector<16x128xf32>
    %5 = tpu.matmul %3, %4, %cst {dimension_numbers = #tpu.dot_dimension_numbers<[1], [0], [0], [1], [0, 0, 1, 1], [], []>} : vector<16x32xf32>, vector<32x128xf32>, vector<16x128xf32> -> vector<16x128xf32>
    %c0_4 = arith.constant 0 : index
    %c0_5 = arith.constant 0 : index
    %6 = vector.load %arg4[%c0_4, %c0_5] : memref<1x128xf32, #tpu.memory_space<vmem>>, vector<1x128xf32>
    %7 = vector.broadcast %6 : vector<1x128xf32> to vector<16x128xf32>
    %8 = arith.addf %5, %7 : vector<16x128xf32>
    %cst_6 = arith.constant 5.000000e-01 : f32
    %9 = vector.broadcast %cst_6 : f32 to vector<16x128xf32>
    %10 = arith.mulf %9, %8 : vector<16x128xf32>
    %cst_7 = arith.constant 4.471500e-02 : f32
    %11 = vector.broadcast %cst_7 : f32 to vector<16x128xf32>
    %12 = arith.mulf %11, %8 : vector<16x128xf32>
    %13 = arith.mulf %12, %8 : vector<16x128xf32>
    %14 = arith.mulf %13, %8 : vector<16x128xf32>
    %15 = arith.addf %8, %14 : vector<16x128xf32>
    %cst_8 = arith.constant 0.797884583 : f32
    %16 = vector.broadcast %cst_8 : f32 to vector<16x128xf32>
    %17 = arith.mulf %16, %15 : vector<16x128xf32>
    %18 = math.tanh %17 : vector<16x128xf32>
    %cst_9 = arith.constant 1.000000e+00 : f32
    %19 = vector.broadcast %cst_9 : f32 to vector<16x128xf32>
    %20 = arith.addf %19, %18 : vector<16x128xf32>
    %21 = arith.mulf %10, %20 : vector<16x128xf32>
    %c0_10 = arith.constant 0 : index
    %c0_11 = arith.constant 0 : index
    %22 = vector.load %arg8[%c0_10, %c0_11] : memref<16x32xf32, #tpu.memory_space<vmem>>, vector<16x32xf32>
    %c0_12 = arith.constant 0 : index
    %c0_13 = arith.constant 0 : index
    %23 = vector.load %arg5[%c0_12, %c0_13] : memref<128x32xf32, #tpu.memory_space<vmem>>, vector<128x32xf32>
    %cst_14 = arith.constant dense<0.000000e+00> : vector<16x32xf32>
    %24 = tpu.matmul %21, %23, %cst_14 {dimension_numbers = #tpu.dot_dimension_numbers<[1], [0], [0], [1], [0, 0, 1, 1], [], []>} : vector<16x128xf32>, vector<128x32xf32>, vector<16x32xf32> -> vector<16x32xf32>
    %25 = arith.addf %22, %24 : vector<16x32xf32>
    %c0_15 = arith.constant 0 : index
    %c0_16 = arith.constant 0 : index
    %26 = vector.load %arg8[%c0_15, %c0_16] : memref<16x32xf32, #tpu.memory_space<vmem>>, vector<16x32xf32>
    tpu.vector_store %arg8[%c0_15, %c0_16], %25 {strides = array<i32>} : memref<16x32xf32, #tpu.memory_space<vmem>>, vector<16x32xf32>,
    %c0_i32_17 = arith.constant 0 : i32
    %27 = arith.cmpi eq, %arg1, %c0_i32_17 : i32
    %28 = arith.extui %27 : i1 to i32
    %c0_i32_18 = arith.constant 0 : i32
    %29 = arith.cmpi ne, %28, %c0_i32_18 : i32
    scf.if %29 {
      %c0_19 = arith.constant 0 : index
      %c0_20 = arith.constant 0 : index
      %30 = vector.load %arg8[%c0_19, %c0_20] : memref<16x32xf32, #tpu.memory_space<vmem>>, vector<16x32xf32>
      %c0_21 = arith.constant 0 : index
      %c0_22 = arith.constant 0 : index
      %31 = vector.load %arg6[%c0_21, %c0_22] : memref<1x32xf32, #tpu.memory_space<vmem>>, vector<1x32xf32>
      %32 = vector.broadcast %31 : vector<1x32xf32> to vector<16x32xf32>
      %33 = arith.addf %30, %32 : vector<16x32xf32>
      %c0_23 = arith.constant 0 : index
      %c0_24 = arith.constant 0 : index
      %34 = vector.load %arg7[%c0_23, %c0_24] : memref<16x32xf32, #tpu.memory_space<vmem>>, vector<16x32xf32>
      tpu.vector_store %arg7[%c0_23, %c0_24], %33 {strides = array<i32>} : memref<16x32xf32, #tpu.memory_space<vmem>>, vector<16x32xf32>,
    } else {
    }
    return
  }
  func.func @transform_0(%arg0: i32, %arg1: i32) -> (i32, i32) {
    %c0_i32 = arith.constant 0 : i32
    %c0_i32_0 = arith.constant 0 : i32
    return %arg0, %c0_i32 : i32, i32
  }
  func.func @transform_1(%arg0: i32, %arg1: i32) -> (i32, i32) {
    %c0_i32 = arith.constant 0 : i32
    %c0_i32_0 = arith.constant 0 : i32
    return %c0_i32, %arg1 : i32, i32
  }
  func.func @transform_2(%arg0: i32, %arg1: i32) -> (i32, i32) {
    %c0_i32 = arith.constant 0 : i32
    %c0_i32_0 = arith.constant 0 : i32
    return %c0_i32, %arg1 : i32, i32
  }
  func.func @transform_3(%arg0: i32, %arg1: i32) -> (i32, i32) {
    %c0_i32 = arith.constant 0 : i32
    %c0_i32_0 = arith.constant 0 : i32
    return %arg1, %c0_i32 : i32, i32
  }
  func.func @transform_4(%arg0: i32, %arg1: i32) -> (i32, i32) {
    %c0_i32 = arith.constant 0 : i32
    %c0_i32_0 = arith.constant 0 : i32
    %c0_i32_1 = arith.constant 0 : i32
    return %c0_i32, %c0_i32_0 : i32, i32
  }
  func.func @transform_5(%arg0: i32, %arg1: i32) -> (i32, i32) {
    %c0_i32 = arith.constant 0 : i32
    %c0_i32_0 = arith.constant 0 : i32
    return %arg0, %c0_i32 : i32, i32
  }
}

</mosaic_0001>

<bundles_post_ra>
// kernel: tpu_custom_call.1
= control target key start
LH: loop header
LB: loop body
LE: loop exit
PB: predicated region body
PF: predicated region fallthrough
CT: control target
= control target key end

     0   :  { %vm25_vm0 = vcmask 261120   ;;  %s491_s0 = inlined_call_operand.vmem [shape: f32[16,32], index: 0, kind: input, shape index: {}]   ;;  %s492_s1 = inlined_call_operand.vmem [shape: f32[32,128], index: 1, kind: input, shape index: {}]   ;;  %s493_s2 = inlined_call_operand.vmem [shape: f32[1,128], index: 2, kind: input, shape index: {}]   ;;  %s494_s3 = inlined_call_operand.vmem [shape: f32[128,32], index: 3, kind: input, shape index: {}]   ;;  %s495_s4 = inlined_call_operand.vmem [shape: f32[1,32], index: 4, kind: input, shape index: {}]   ;;  %s496_s5 = inlined_call_operand.hbm [shape: f32[16,32], index: 5, kind: output, shape index: {}]  }
   0x1   :  { %v33_v0 = vld [vmem:[%s492_s1 + $0x18] sm:$0xff]  ;;  %v32_v1 = vld [vmem:[%s492_s1 + $0x10] sm:$0xff]  ;;  %v28_v2 = vld [vmem:[%s491_s0] sm:$0xff] }
   0x2   :  { %298 = vmatprep.subr.mxu0 %v33_v0  ;;  %v31_v3 = vld [vmem:[%s492_s1 + $0x8] sm:$0xff]  ;;  %306 = vmatprep.mubr.msk.f32.mxu0 %vm25_vm0, %v28_v2 }
   0x3   :  { %299 = vmatpush3.msra.mxu0 %v33_v0 }
   0x4   :  { %10 = vsyncpa [#allocation4], 0  ;;  %300 = vmatprep.subr.mxu0 %v32_v1  ;;  %v30_v4 = vld [vmem:[%s492_s1] sm:$0xff]  ;;  %v29_v5 = vld [vmem:[%s491_s0 + $0x8] sm:$0xff]  ;;  %v374_v22 = vmov 0.0   ;;  %s375_s10 = smov [#allocation3]  }
   0x5   :  { %301 = vmatpush3.msra.mxu0 %v32_v1  ;;  %v158_v6 = vld [vmem:[%s494_s3 + $0x78] sm:$0xff]  ;;  %v157_v7 = vld [vmem:[%s494_s3 + $0x70] sm:$0xff]  ;;  %v156_v8 = vld [vmem:[%s494_s3 + $0x68] sm:$0xff]  ;;  %27 = vst.msk [vmem:[#allocation2 + $0x8] sm:$0xff] %vm25_vm0, %v374_v22  ;;  %s259_s11 = sshll.u32 %s375_s10, 4  ;;  %s260_s11 = int_to_ptr.vmem [resolvable:$true] %s259_s11 }
   0x6   :  { %302 = vmatprep.subr.mxu0 %v31_v3  ;;  %309 = vmatprep.subr.mxu1 %v158_v6  ;;  %v155_v9 = vld [vmem:[%s494_s3 + $0x60] sm:$0xff]  ;;  %v154_v10 = vld [vmem:[%s494_s3 + $0x58] sm:$0xff]  ;;  %v153_v11 = vld [vmem:[%s494_s3 + $0x50] sm:$0xff]  ;;  %26 = vst.msk [vmem:[#allocation2] sm:$0xff] %vm25_vm0, %v374_v22  ;;  %s352_s12 = scalar_lea.vmem %s260_s11, 256  ;;  %p357_p1 = scmp.lt.s32.totalorder %s260_s11, %s260_s11 }
   0x7   :  { %303 = vmatpush3.msra.mxu0 %v31_v3  ;;  %310 = vmatpush3.msra.mxu1 %v158_v6  ;;  %v152_v12 = vld [vmem:[%s494_s3 + $0x48] sm:$0xff]  ;;  %v151_v13 = vld [vmem:[%s494_s3 + $0x40] sm:$0xff]  ;;  %v150_v14 = vld [vmem:[%s494_s3 + $0x38] sm:$0xff]  ;;  %p353_p0 = scmp.ne.s32.totalorder %s260_s11, %s352_s12  ;;  %p358_p2 = scmp.lt.s32.totalorder %s352_s12, %s352_s12 }
   0x8   :  { %304 = vmatprep.subr.mxu0 %v30_v4  ;;  %311 = vmatprep.subr.mxu1 %v157_v7  ;;  %v149_v15 = vld [vmem:[%s494_s3 + $0x30] sm:$0xff]  ;;  %v148_v16 = vld [vmem:[%s494_s3 + $0x28] sm:$0xff]  ;;  %v147_v17 = vld [vmem:[%s494_s3 + $0x20] sm:$0xff] }
   0x9   :  { %305 = vmatpush3.msra.mxu0 %v30_v4  ;;  %312 = vmatpush3.msra.mxu1 %v157_v7  ;;  %v146_v18 = vld [vmem:[%s494_s3 + $0x18] sm:$0xff]  ;;  %v145_v19 = vld [vmem:[%s494_s3 + $0x10] sm:$0xff]  ;;  %v144_v20 = vld [vmem:[%s494_s3 + $0x8] sm:$0xff]  ;;  %p359_p3 = por %p358_p2, %p357_p1 }
   0xa   :  { %307 = vmatmul.mubr.msk.f32.vlgmr.msra.gmra.mxu0 %vm25_vm0, %v29_v5  ;;  %313 = vmatprep.subr.mxu1 %v156_v8  ;;  %v143_v21 = vld [vmem:[%s494_s3] sm:$0xff] }
   0xb   :  { %314 = vmatpush3.msra.mxu1 %v156_v8  ;;  %v270_v23 = vld [vmem:[%s493_s2] ss:$0 sm:$0xff]  ;;  %p360_p4 = pnand %p359_p3, %p353_p0 }
   0xc   :  { %315 = vmatprep.subr.mxu1 %v155_v9  ;;  %v142_v46 = vld [vmem:[#allocation2 + $0x8] sm:$0xff]  ;;  %v273_v52 = vld [vmem:[%s495_s4] ss:$0 sm:$0xff] }
   0xd   :  { %316 = vmatpush3.msra.mxu1 %v155_v9  ;;  %v141_v48 = vld [vmem:[#allocation2] sm:$0xff] }
   0xe   :  { %317 = vmatprep.subr.mxu1 %v154_v10 }
   0xf   :  { %318 = vmatpush3.msra.mxu1 %v154_v10 }
  0x10   :  { %319 = vmatprep.subr.mxu1 %v153_v11 }
  0x11   :  { %320 = vmatpush3.msra.mxu1 %v153_v11 }
  0x12   :  { %321 = vmatprep.subr.mxu1 %v152_v12 }
  0x13   :  { %322 = vmatpush3.msra.mxu1 %v152_v12 }
  0x14   :  { %323 = vmatprep.subr.mxu1 %v151_v13 }
  0x15   :  { %324 = vmatpush3.msra.mxu1 %v151_v13 }
  0x16   :  { %325 = vmatprep.subr.mxu1 %v150_v14 }
  0x17   :  { %326 = vmatpush3.msra.mxu1 %v150_v14 }
  0x18   :  { %327 = vmatprep.subr.mxu1 %v149_v15 }
  0x19   :  { %328 = vmatpush3.msra.mxu1 %v149_v15 }
  0x1a   :  { %329 = vmatprep.subr.mxu1 %v148_v16 }
  0x1b   :  { %330 = vmatpush3.msra.mxu1 %v148_v16 }
  0x1c   :  { %331 = vmatprep.subr.mxu1 %v147_v17 }
  0x1d   :  { %332 = vmatpush3.msra.mxu1 %v147_v17 }
  0x1e   :  { %333 = vmatprep.subr.mxu1 %v146_v18 }
  0x1f   :  { %334 = vmatpush3.msra.mxu1 %v146_v18 }
  0x20   :  { %335 = vmatprep.subr.mxu1 %v145_v19 }
  0x21   :  { %336 = vmatpush3.msra.mxu1 %v145_v19 }
  0x22   :  { %337 = vmatprep.subr.mxu1 %v144_v20 }
  0x23   :  { %338 = vmatpush3.msra.mxu1 %v144_v20 }
  0x24   :  { %339 = vmatprep.subr.mxu1 %v143_v21 }
  0x25   :  { %340 = vmatpush3.msra.mxu1 %v143_v21 }
  0xca   :  { %v308_v24 = vpop.f32.mrf.mxu0 }
  0xcb   :  { %v120_v25 = vadd.f32 %v308_v24, %v270_v23 }
  0xcc   :  { %v114_v26 = vpop.f32.mrf.mxu0 }
  0xcd   :  { %v126_v27 = vmul.f32 0.044715, %v120_v25  ;;  %v115_v28 = vadd.f32 %v270_v23, %v114_v26  ;;  %v124_v43 = vmul.f32 0.5, %v120_v25 }
  0xcf   :  { %v128_v29 = vmul.f32 %v126_v27, %v120_v25  ;;  %v125_v30 = vmul.f32 0.044715, %v115_v28  ;;  %v123_v41 = vmul.f32 0.5, %v115_v28 }
  0xd1   :  { %v127_v31 = vmul.f32 %v125_v30, %v115_v28  ;;  %v130_v32 = vmul.f32 %v128_v29, %v120_v25 }
  0xd3   :  { %v129_v33 = vmul.f32 %v127_v31, %v115_v28  ;;  %v132_v34 = vadd.f32 %v130_v32, %v120_v25 }
  0xd5   :  { %v131_v35 = vadd.f32 %v129_v33, %v115_v28  ;;  %v134_v36 = vmul.f32 0.7978846, %v132_v34 }
  0xd7   :  { %v133_v37 = vmul.f32 0.7978846, %v131_v35  ;;  %348 = vtanh.f32 %v134_v36 }
  0xd9   :  { %350 = vtanh.f32 %v133_v37 }
  0xe4   :  { %v349_v38 = vpop.eup %348 }
  0xe5   :  { %v138_v40 = vadd.f32 1.0, %v349_v38 }
  0xe6   :  { %v351_v39 = vpop.eup %350 }
  0xe7   :  { %v137_v42 = vadd.f32 1.0, %v351_v39  ;;  %v140_v45 = vmul.f32 %v138_v40, %v124_v43 }
  0xe9   :  { %v139_v44 = vmul.f32 %v137_v42, %v123_v41 }
  0xeb   :  { %341 = vmatprep.mubr.f32.mxu1 %v139_v44 }
  0xec   :  { %342 = vmatmul.mubr.f32.vlgmr.msra.gmra.mxu1 %v140_v45 }
 0x1ac   :  { %v343_v47 = vpop.f32.mrf.mxu1 }
 0x1ad   :  { %v235_v49 = vadd.f32 %v343_v47, %v142_v46 }
 0x1ae   :  { %v225_v50 = vpop.f32.mrf.mxu1 }
 0x1af   :  { %237 = vst.msk [vmem:[#allocation2 + $0x8] sm:$0xff] %vm25_vm0, %v235_v49  ;;  %v234_v51 = vadd.f32 %v225_v50, %v141_v48 }
 0x1b1   :  { %236 = vst.msk [vmem:[#allocation2] sm:$0xff] %vm25_vm0, %v234_v51 }
 0x1b6   :  { %v242_v53 = vld [vmem:[#allocation2 + $0x8] sm:$0xff] }
 0x1b7   :  { %v251_v54 = vadd.f32 %v273_v52, %v242_v53 }
 0x1b8   :  { %v241_v55 = vld [vmem:[#allocation2] sm:$0xff] }
 0x1b9   :  { %v250_v56 = vadd.f32 %v273_v52, %v241_v55  ;;  %253 = vst.msk [vmem:[#allocation3 + $0x8] sm:$0xff] %vm25_vm0, %v251_v54 }
 0x1bb   :  { %252 = vst.msk [vmem:[#allocation3] sm:$0xff] %vm25_vm0, %v250_v56 }
 0x1bc   :  { %363 = shalt.err (!%p360_p4)
}
 0x1bd   :  { %s376_s13 = smov 128   ;;  %s377_s4 = smov 8  }
 0x1be   :  { %265 = dma.vmem_to_hbm [thread:$0]  %s260_s11, 256, %s496_s5, [#allocation4], %s376_s13, %s376_s13, %s377_s4  }
 0x1bf   :  { %372 = dma.done.wait [#allocation4], 256  }
 0x1c0   :  { %373 = vsyncadd [#allocation4], 4294967040 }
 0x1c1   :  { %269 = vsyncpa [#allocation4], 1 }

</bundles_post_ra>
